<compile_context>
chip_gen: v6e
topology: v6e:2x2x1
jax: 0.10.0
libtpu: 0.0.40
codegen_flags: <defaults>
</compile_context>

<pallas_src>
import math
import jax
import jax.numpy as jnp
from jax.experimental import pallas as pl
from jax.experimental.pallas import tpu as pltpu

U_LIM = 250.0
LEAKY_SLOPE = 0.01                                       # PyTorch nn.LeakyReLU default
DIMS = [(4, 16), (16, 64), (64, 32), (32, 8), (8, 1)]    # (fan_in, fan_out)

_MAX_TILE_B = 64 * 1024                                  # 4*64K*4B = 1 MiB x-tile


def _leaky_relu(h):
    return jnp.where(h > 0, h, LEAKY_SLOPE * h)


def acrobot_kernel(x_ref,
                   w1_ref, b1_ref, w2_ref, b2_ref, w3_ref, b3_ref,
                   w4_ref, b4_ref, w5_ref, b5_ref,
                   o_ref):
    # Lane-dense MLP: activations are (features, TB); TB maps onto the 128 lanes.
    h = x_ref[...]                                                        # (4, TB)

    h = jnp.sin(jnp.dot(w1_ref[...], h, preferred_element_type=jnp.float32)
                + b1_ref[...])                                            # (16, TB)
    h = _leaky_relu(jnp.dot(w2_ref[...], h, preferred_element_type=jnp.float32)
                    + b2_ref[...])                                        # (64, TB)
    h = _leaky_relu(jnp.dot(w3_ref[...], h, preferred_element_type=jnp.float32)
                    + b3_ref[...])                                        # (32, TB)
    h = jnp.sin(jnp.dot(w4_ref[...], h, preferred_element_type=jnp.float32)
                + b4_ref[...])                                            # (8, TB)
    h = jnp.dot(w5_ref[...], h, preferred_element_type=jnp.float32) + b5_ref[...]

    o_ref[...] = U_LIM * jnp.tanh(h)                                      # (1, TB)


def init_params(key):
    """Deterministic xavier_uniform weights (zero biases), matching nn.init.

    Weights stored as (out_features, in_features) (PyTorch-native),
    biases as (out_features, 1) for lane-broadcast inside the kernel.
    """
    params = []
    keys = jax.random.split(key, len(DIMS))
    for k, (fan_in, fan_out) in zip(keys, DIMS):
        bound = math.sqrt(6.0 / (fan_in + fan_out))
        w = jax.random.uniform(k, (fan_out, fan_in), jnp.float32, -bound, bound)
        b = jnp.zeros((fan_out, 1), jnp.float32)
        params.append((w, b))
    return params


def _round_up(n, m):
    return ((n + m - 1) // m) * m


def _choose_tile_b(batch_lane_aligned):
    """Pick a lane-aligned batch tile: >=2 grid steps when possible (megacore),
    each tile as large as possible (fewer per-step overheads) under a VMEM cap."""
    if batch_lane_aligned <= 128:
        return 128
    half = _round_up(batch_lane_aligned // 2, 128)
    return max(128, min(half, _MAX_TILE_B))


def acrobot_controller(x, params, tile_b=None):
    """x: (B, 4) batch-major (PyTorch layout). Returns (B, 1)."""
    B, F = x.shape
    assert F == 4, "AcrobotController expects 4 state features"

    B128 = _round_up(B, 128)
    if tile_b is None:
        tile_b = _choose_tile_b(B128)
    assert tile_b % 128 == 0, "batch tile must be lane-aligned (multiple of 128)"

    # Pad batch to a multiple of the tile and move batch into the lane dim
    # (layout plumbing only; padded columns are computed but discarded).
    B_pad = _round_up(B128, tile_b)
    xT = jnp.zeros((4, B_pad), jnp.float32).at[:, :B].set(x.T)

    flat_params = [p for wb in params for p in wb]

    # Weights/biases are tiny: constant-index full-array blocks (VMEM resident,
    # DMA'd once since their block index never changes across the grid).
    def full_spec(arr):
        return pl.BlockSpec(arr.shape, lambda i: (0, 0))

    in_specs = [pl.BlockSpec((4, tile_b), lambda i: (0, i))]       # lane-dense x
    in_specs += [full_spec(p) for p in flat_params]
    out_spec = pl.BlockSpec((1, tile_b), lambda i: (0, i))         # lane-dense out

    flops = 2 * B_pad * sum(fi * fo for fi, fo in DIMS)
    transcendentals = B_pad * (16 + 8 + 1)                         # sin, sin, tanh
    bytes_accessed = 4 * (B_pad * (4 + 1)
                          + sum(fi * fo + fo for fi, fo in DIMS))

    out_T = pl.pallas_call(
        acrobot_kernel,
        out_shape=jax.ShapeDtypeStruct((1, B_pad), jnp.float32),
        grid_spec=pltpu.PrefetchScalarGridSpec(
            num_scalar_prefetch=0,
            grid=(B_pad // tile_b,),
            in_specs=in_specs,
            out_specs=out_spec,
        ),
        compiler_params=pltpu.CompilerParams(
            dimension_semantics=("parallel",),      # shard grid across TCs (v7x)
        ),
        cost_estimate=pl.CostEstimate(
            flops=flops,
            transcendentals=transcendentals,
            bytes_accessed=bytes_accessed,
        ),
    )(xT, *flat_params)

    # Free layout plumbing back to PyTorch's (B, 1).
    return out_T[:, :B].T


def acrobot_controller_ref(x, params):
    """Pure-JAX reference (batch-major, same math) for correctness checking."""
    (w1, b1), (w2, b2), (w3, b3), (w4, b4), (w5, b5) = params
    h = jnp.sin(x @ w1.T + b1.T)
    h = _leaky_relu(h @ w2.T + b2.T)
    h = _leaky_relu(h @ w3.T + b3.T)
    h = jnp.sin(h @ w4.T + b4.T)
    h = h @ w5.T + b5.T
    return U_LIM * jnp.tanh(h)


if __name__ == "__main__":
    key = jax.random.PRNGKey(0)
    k_param, k_x = jax.random.split(key)

    params = init_params(k_param)

    # Acrobot state is (theta1, theta2, dtheta1, dtheta2) -> 4 features.
    B = 256
    x = jax.random.normal(k_x, (B, 4), jnp.float32)

    # Auto tiling picks tile_b=128 here -> grid of 2 parallel steps
    # (both v7x TensorCores busy); larger batches get larger tiles.
    out = acrobot_controller(x, params)
    out = jax.block_until_ready(out)

    ref = acrobot_controller_ref(x, params)
    assert out.shape == (B, 1)
    assert jnp.allclose(out, ref, atol=1e-3, rtol=1e-3), "mismatch vs reference"

    print("KERNEL_OK")
</pallas_src>

<mosaic_0001>
module attributes {stable_mosaic.version = 11 : i64} {
  func.func @acrobot_kernel(%arg0: i32, %arg1: memref<4x128xf32, #tpu.memory_space<vmem>>, %arg2: memref<16x4xf32, #tpu.memory_space<vmem>>, %arg3: memref<16x1xf32, #tpu.memory_space<vmem>>, %arg4: memref<64x16xf32, #tpu.memory_space<vmem>>, %arg5: memref<64x1xf32, #tpu.memory_space<vmem>>, %arg6: memref<32x64xf32, #tpu.memory_space<vmem>>, %arg7: memref<32x1xf32, #tpu.memory_space<vmem>>, %arg8: memref<8x32xf32, #tpu.memory_space<vmem>>, %arg9: memref<8x1xf32, #tpu.memory_space<vmem>>, %arg10: memref<1x8xf32, #tpu.memory_space<vmem>>, %arg11: memref<1x1xf32, #tpu.memory_space<vmem>>, %arg12: memref<1x128xf32, #tpu.memory_space<vmem>>) attributes {dimension_semantics = [#tpu.dimension_semantics<parallel>], iteration_bounds = array<i64: 2>, scalar_prefetch = 0 : i64, scratch_operands = 0 : i64, tpu.core_type = #tpu.core_type<tc>, window_params = [{transform_indices = @transform_0, window_bounds = array<i64: 4, 128>}, {pipeline_mode = #tpu.pipeline_mode<synchronous>, transform_indices = @transform_1, window_bounds = array<i64: 16, 4>}, {pipeline_mode = #tpu.pipeline_mode<synchronous>, transform_indices = @transform_2, window_bounds = array<i64: 16, 1>}, {pipeline_mode = #tpu.pipeline_mode<synchronous>, transform_indices = @transform_3, window_bounds = array<i64: 64, 16>}, {pipeline_mode = #tpu.pipeline_mode<synchronous>, transform_indices = @transform_4, window_bounds = array<i64: 64, 1>}, {pipeline_mode = #tpu.pipeline_mode<synchronous>, transform_indices = @transform_5, window_bounds = array<i64: 32, 64>}, {pipeline_mode = #tpu.pipeline_mode<synchronous>, transform_indices = @transform_6, window_bounds = array<i64: 32, 1>}, {pipeline_mode = #tpu.pipeline_mode<synchronous>, transform_indices = @transform_7, window_bounds = array<i64: 8, 32>}, {pipeline_mode = #tpu.pipeline_mode<synchronous>, transform_indices = @transform_8, window_bounds = array<i64: 8, 1>}, {pipeline_mode = #tpu.pipeline_mode<synchronous>, transform_indices = @transform_9, window_bounds = array<i64: 1, 8>}, {pipeline_mode = #tpu.pipeline_mode<synchronous>, transform_indices = @transform_10, window_bounds = array<i64: 1, 1>}, {transform_indices = @transform_11, window_bounds = array<i64: 1, 128>}]} {
    %c0 = arith.constant 0 : index
    %c0_0 = arith.constant 0 : index
    %0 = vector.load %arg1[%c0, %c0_0] : memref<4x128xf32, #tpu.memory_space<vmem>>, vector<4x128xf32>
    %c0_1 = arith.constant 0 : index
    %c0_2 = arith.constant 0 : index
    %1 = vector.load %arg2[%c0_1, %c0_2] : memref<16x4xf32, #tpu.memory_space<vmem>>, vector<16x4xf32>
    %cst = arith.constant dense<0.000000e+00> : vector<16x128xf32>
    %2 = tpu.matmul %1, %0, %cst {dimension_numbers = #tpu.dot_dimension_numbers<[1], [0], [0], [1], [0, 0, 1, 1], [], []>} : vector<16x4xf32>, vector<4x128xf32>, vector<16x128xf32> -> vector<16x128xf32>
    %c0_3 = arith.constant 0 : index
    %c0_4 = arith.constant 0 : index
    %3 = vector.load %arg3[%c0_3, %c0_4] : memref<16x1xf32, #tpu.memory_space<vmem>>, vector<16x1xf32>
    %4 = vector.broadcast %3 : vector<16x1xf32> to vector<16x128xf32>
    %5 = arith.addf %2, %4 : vector<16x128xf32>
    %6 = math.sin %5 : vector<16x128xf32>
    %c0_5 = arith.constant 0 : index
    %c0_6 = arith.constant 0 : index
    %7 = vector.load %arg4[%c0_5, %c0_6] : memref<64x16xf32, #tpu.memory_space<vmem>>, vector<64x16xf32>
    %cst_7 = arith.constant dense<0.000000e+00> : vector<64x128xf32>
    %8 = tpu.matmul %7, %6, %cst_7 {dimension_numbers = #tpu.dot_dimension_numbers<[1], [0], [0], [1], [0, 0, 1, 1], [], []>} : vector<64x16xf32>, vector<16x128xf32>, vector<64x128xf32> -> vector<64x128xf32>
    %c0_8 = arith.constant 0 : index
    %c0_9 = arith.constant 0 : index
    %9 = vector.load %arg5[%c0_8, %c0_9] : memref<64x1xf32, #tpu.memory_space<vmem>>, vector<64x1xf32>
    %10 = vector.broadcast %9 : vector<64x1xf32> to vector<64x128xf32>
    %11 = arith.addf %8, %10 : vector<64x128xf32>
    %cst_10 = arith.constant 0.000000e+00 : f32
    %12 = vector.broadcast %cst_10 : f32 to vector<64x128xf32>
    %13 = arith.cmpf ogt, %11, %12 : vector<64x128xf32>
    %cst_11 = arith.constant 0.00999999977 : f32
    %14 = vector.broadcast %cst_11 : f32 to vector<64x128xf32>
    %15 = arith.mulf %14, %11 : vector<64x128xf32>
    %16 = arith.select %13, %11, %15 : vector<64x128xi1>, vector<64x128xf32>
    %c0_12 = arith.constant 0 : index
    %c0_13 = arith.constant 0 : index
    %17 = vector.load %arg6[%c0_12, %c0_13] : memref<32x64xf32, #tpu.memory_space<vmem>>, vector<32x64xf32>
    %cst_14 = arith.constant dense<0.000000e+00> : vector<32x128xf32>
    %18 = tpu.matmul %17, %16, %cst_14 {dimension_numbers = #tpu.dot_dimension_numbers<[1], [0], [0], [1], [0, 0, 1, 1], [], []>} : vector<32x64xf32>, vector<64x128xf32>, vector<32x128xf32> -> vector<32x128xf32>
    %c0_15 = arith.constant 0 : index
    %c0_16 = arith.constant 0 : index
    %19 = vector.load %arg7[%c0_15, %c0_16] : memref<32x1xf32, #tpu.memory_space<vmem>>, vector<32x1xf32>
    %20 = vector.broadcast %19 : vector<32x1xf32> to vector<32x128xf32>
    %21 = arith.addf %18, %20 : vector<32x128xf32>
    %cst_17 = arith.constant 0.000000e+00 : f32
    %22 = vector.broadcast %cst_17 : f32 to vector<32x128xf32>
    %23 = arith.cmpf ogt, %21, %22 : vector<32x128xf32>
    %cst_18 = arith.constant 0.00999999977 : f32
    %24 = vector.broadcast %cst_18 : f32 to vector<32x128xf32>
    %25 = arith.mulf %24, %21 : vector<32x128xf32>
    %26 = arith.select %23, %21, %25 : vector<32x128xi1>, vector<32x128xf32>
    %c0_19 = arith.constant 0 : index
    %c0_20 = arith.constant 0 : index
    %27 = vector.load %arg8[%c0_19, %c0_20] : memref<8x32xf32, #tpu.memory_space<vmem>>, vector<8x32xf32>
    %cst_21 = arith.constant dense<0.000000e+00> : vector<8x128xf32>
    %28 = tpu.matmul %27, %26, %cst_21 {dimension_numbers = #tpu.dot_dimension_numbers<[1], [0], [0], [1], [0, 0, 1, 1], [], []>} : vector<8x32xf32>, vector<32x128xf32>, vector<8x128xf32> -> vector<8x128xf32>
    %c0_22 = arith.constant 0 : index
    %c0_23 = arith.constant 0 : index
    %29 = vector.load %arg9[%c0_22, %c0_23] : memref<8x1xf32, #tpu.memory_space<vmem>>, vector<8x1xf32>
    %30 = vector.broadcast %29 : vector<8x1xf32> to vector<8x128xf32>
    %31 = arith.addf %28, %30 : vector<8x128xf32>
    %32 = math.sin %31 : vector<8x128xf32>
    %c0_24 = arith.constant 0 : index
    %c0_25 = arith.constant 0 : index
    %33 = vector.load %arg10[%c0_24, %c0_25] : memref<1x8xf32, #tpu.memory_space<vmem>>, vector<1x8xf32>
    %cst_26 = arith.constant dense<0.000000e+00> : vector<1x128xf32>
    %34 = tpu.matmul %33, %32, %cst_26 {dimension_numbers = #tpu.dot_dimension_numbers<[1], [0], [0], [1], [0, 0, 1, 1], [], []>} : vector<1x8xf32>, vector<8x128xf32>, vector<1x128xf32> -> vector<1x128xf32>
    %c0_27 = arith.constant 0 : index
    %c0_28 = arith.constant 0 : index
    %35 = vector.load %arg11[%c0_27, %c0_28] : memref<1x1xf32, #tpu.memory_space<vmem>>, vector<1x1xf32>
    %36 = vector.broadcast %35 : vector<1x1xf32> to vector<1x128xf32>
    %37 = arith.addf %34, %36 : vector<1x128xf32>
    %38 = math.tanh %37 : vector<1x128xf32>
    %cst_29 = arith.constant 2.500000e+02 : f32
    %39 = vector.broadcast %cst_29 : f32 to vector<1x128xf32>
    %40 = arith.mulf %39, %38 : vector<1x128xf32>
    %c0_30 = arith.constant 0 : index
    %c0_31 = arith.constant 0 : index
    %41 = vector.load %arg12[%c0_30, %c0_31] : memref<1x128xf32, #tpu.memory_space<vmem>>, vector<1x128xf32>
    tpu.vector_store %arg12[%c0_30, %c0_31], %40 {strides = array<i32>} : memref<1x128xf32, #tpu.memory_space<vmem>>, vector<1x128xf32>,
    return
  }
  func.func @transform_0(%arg0: i32) -> (i32, i32) {
    %c0_i32 = arith.constant 0 : i32
    %c0_i32_0 = arith.constant 0 : i32
    return %c0_i32, %arg0 : i32, i32
  }
  func.func @transform_1(%arg0: i32) -> (i32, i32) {
    %c0_i32 = arith.constant 0 : i32
    %c0_i32_0 = arith.constant 0 : i32
    %c0_i32_1 = arith.constant 0 : i32
    return %c0_i32, %c0_i32_0 : i32, i32
  }
  func.func @transform_2(%arg0: i32) -> (i32, i32) {
    %c0_i32 = arith.constant 0 : i32
    %c0_i32_0 = arith.constant 0 : i32
    %c0_i32_1 = arith.constant 0 : i32
    return %c0_i32, %c0_i32_0 : i32, i32
  }
  func.func @transform_3(%arg0: i32) -> (i32, i32) {
    %c0_i32 = arith.constant 0 : i32
    %c0_i32_0 = arith.constant 0 : i32
    %c0_i32_1 = arith.constant 0 : i32
    return %c0_i32, %c0_i32_0 : i32, i32
  }
  func.func @transform_4(%arg0: i32) -> (i32, i32) {
    %c0_i32 = arith.constant 0 : i32
    %c0_i32_0 = arith.constant 0 : i32
    %c0_i32_1 = arith.constant 0 : i32
    return %c0_i32, %c0_i32_0 : i32, i32
  }
  func.func @transform_5(%arg0: i32) -> (i32, i32) {
    %c0_i32 = arith.constant 0 : i32
    %c0_i32_0 = arith.constant 0 : i32
    %c0_i32_1 = arith.constant 0 : i32
    return %c0_i32, %c0_i32_0 : i32, i32
  }
  func.func @transform_6(%arg0: i32) -> (i32, i32) {
    %c0_i32 = arith.constant 0 : i32
    %c0_i32_0 = arith.constant 0 : i32
    %c0_i32_1 = arith.constant 0 : i32
    return %c0_i32, %c0_i32_0 : i32, i32
  }
  func.func @transform_7(%arg0: i32) -> (i32, i32) {
    %c0_i32 = arith.constant 0 : i32
    %c0_i32_0 = arith.constant 0 : i32
    %c0_i32_1 = arith.constant 0 : i32
    return %c0_i32, %c0_i32_0 : i32, i32
  }
  func.func @transform_8(%arg0: i32) -> (i32, i32) {
    %c0_i32 = arith.constant 0 : i32
    %c0_i32_0 = arith.constant 0 : i32
    %c0_i32_1 = arith.constant 0 : i32
    return %c0_i32, %c0_i32_0 : i32, i32
  }
  func.func @transform_9(%arg0: i32) -> (i32, i32) {
    %c0_i32 = arith.constant 0 : i32
    %c0_i32_0 = arith.constant 0 : i32
    %c0_i32_1 = arith.constant 0 : i32
    return %c0_i32, %c0_i32_0 : i32, i32
  }
  func.func @transform_10(%arg0: i32) -> (i32, i32) {
    %c0_i32 = arith.constant 0 : i32
    %c0_i32_0 = arith.constant 0 : i32
    %c0_i32_1 = arith.constant 0 : i32
    return %c0_i32, %c0_i32_0 : i32, i32
  }
  func.func @transform_11(%arg0: i32) -> (i32, i32) {
    %c0_i32 = arith.constant 0 : i32
    %c0_i32_0 = arith.constant 0 : i32
    return %c0_i32, %arg0 : i32, i32
  }
}

</mosaic_0001>

<bundles_post_ra>
// kernel: tpu_custom_call.1
= control target key start
LH: loop header
LB: loop body
LE: loop exit
PB: predicated region body
PF: predicated region fallthrough
CT: control target
= control target key end

     0   :  { %s2071_s0 = inlined_call_operand.vmem [shape: f32[4,256], index: 0, kind: input, shape index: {}]   ;;  %s2072_s1 = inlined_call_operand.vmem [shape: f32[16,4], index: 1, kind: input, shape index: {}]   ;;  %s2073_s2 = inlined_call_operand.vmem [shape: f32[16,1], index: 2, kind: input, shape index: {}]   ;;  %s2074_s3 = inlined_call_operand.vmem [shape: f32[64,16], index: 3, kind: input, shape index: {}]   ;;  %s2075_s4 = inlined_call_operand.vmem [shape: f32[64,1], index: 4, kind: input, shape index: {}]   ;;  %s2076_s5 = inlined_call_operand.vmem [shape: f32[32,64], index: 5, kind: input, shape index: {}]   ;;  %s2077_s6 = inlined_call_operand.vmem [shape: f32[32,1], index: 6, kind: input, shape index: {}]   ;;  %s2078_s7 = inlined_call_operand.vmem [shape: f32[8,32], index: 7, kind: input, shape index: {}]   ;;  %s2079_s8 = inlined_call_operand.vmem [shape: f32[8,1], index: 8, kind: input, shape index: {}]   ;;  %s2080_s9 = inlined_call_operand.vmem [shape: f32[1,8], index: 9, kind: input, shape index: {}]   ;;  %s2081_s10 = inlined_call_operand.<no memory space> [shape: f32[1,1], index: 10, kind: input, shape index: {}]   ;;  %s2082_s11 = inlined_call_operand.hbm [shape: f32[1,256], index: 11, kind: output, shape index: {}]  }
   0x1   :  { %2083 = sst [smem:[#allocation6_spill]] %s2071_s0  ;;  %v16_v0 = vstv %s2081_s10 }
   0x2   :  { %17 = vst [vmem:[#allocation2] sm:$0x1] %v16_v0 }
   0x3   :  { %18 = vsyncpa [#allocation4], 0 }
   0x4   :  { %20 = vsyncpa [#allocation4 + $0x1], 0  ;;  %s1720_s19 = smov 0   ;;  %s1722_s20 = smov 0  }
   0x5   :  { %s1724_s21 = smov 0   ;;  %s1726_s22 = smov 0  }
   0x6 LB: > { %s1741_s10 = sadd.s32 4294967295, %s1645_s22   ;;  %s1381_s23 = sadd.s32 4294967294, %s1645_s22   ;;  %s1645_s22 = sphi %s1726_s22, %s2092_s22   ;;  %s1641_s21 = sphi %s1724_s21, %s2091_s21   ;;  %s1637_s20 = sphi %s1722_s20, %s2090_s20   ;;  %s1633_s19 = sphi %s1720_s19, %s2089_s19  }
   0x7   : > { %s1745_s24 = sadd.s32 1, %s1645_s22   ;;  %s269_s25 = sadd.s32 1, %s1641_s21 }
   0x8   : > { %s266_s26 = ssub.s32 %s1645_s22, %s1745_s24  ;;  %p279_p0 = scmp.ne.s32.totalorder %s1641_s21, %s1637_s20 }
   0x9   : > { %p267_p1 = scmp.eq.s32.totalorder %s266_s26, 0  ;;  %p280_p2 = scmp.eq.s32.totalorder %s1741_s10, 1 }
   0xa   : > { %p285_p3 = scmp.ne.s32.totalorder %s1637_s20, %s1633_s19  ;;  %p286_p4 = scmp.eq.s32.totalorder %s1381_s23, 1 }
   0xb   : > { %s1756_s27 = scalar_select %p267_p1, %s1641_s21, %s269_s25  }
   0xc   : > { %p1758_p5 = por %p280_p2, %p279_p0  ;;  %p1762_p6 = por %p286_p4, %p285_p3 }
   0xd   : > { %p1384_p7 = scmp.ge.s32.totalorder %s1645_s22, 1  ;;  %p341_p8 = scmp.lt.s32.totalorder %s1645_s22, 3 }
   0xf   : > { %p342_p9 = pnand %p1384_p7, %p341_p8 }
  0x10   : > { %p379_p10 = scmp.lt.s32.totalorder (!%p342_p9), %s1741_s10, 1  ;;  %s2086_s0 = sld [smem:[#allocation6_spill]] (!%p342_p9) }
  0x11   : > { %345 = sbr.rel (%p342_p9) target bundleno = 1258 (0x4ea), region = 64  ;;  %s377_s12 = sand.u32 (!%p342_p9), 1, %s1637_s20  }
  0x12   : > { %s1415_s13 = sshll.u32 (!%p342_p9), %s1741_s10, 4  ;;  %s378_s14 = scalar_lea.vmem (!%p342_p9), [#allocation3], %s377_s12 }
  0x13   : > { %s1314_s23 = scalar_lea.sflag (!%p342_p9), [#allocation4], %s377_s12 }
  0x16   : > { %v384_v1 = vld [vmem:[%s2072_s1] sm:$0xff]  ;;  %vm398_vm0 = vcmask 31744   ;;  %v1647_v2 = vmov 0   ;;  %v387_v3 = vld [vmem:[%s2073_s2 + $0x8] sm:$0xff]  ;;  %s380_s15 = scalar_select %p379_p10, %s1741_s10, 1  ;;  %vm405_vm1 = vcmask 1043456  }
  0x17   : > { %1452 = vmatprep.mubr.msk.f32.mxu0 %vm398_vm0, %v384_v1  ;;  %1569 = vset.pattern.permute.xlu0 %v1647_v2  ;;  %v386_v4 = vld [vmem:[%s2073_s2] sm:$0xff]  ;;  %v385_v6 = vld [vmem:[%s2072_s1 + $0x8] sm:$0xff]  ;;  %v703_v8 = vld [vmem:[%s2075_s4 + $0x18] sm:$0xff]  ;;  %vm748_vm2 = vcmask 130048   ;;  %v1648_v46 = vmov 2102212464  }
  0x18   : > { %395 = vperm.xlu0 %1569, %v387_v3   ;;  %1570 = vset.pattern.permute.xlu1 %v1647_v2  ;;  %s1385_s18 = sshll.u32 %s380_s15, 2  ;;  %v705_v7 = vld [vmem:[%s2075_s4 + $0x28] sm:$0xff]  ;;  %v909_v10 = vld [vmem:[%s2077_s6 + $0x18] sm:$0xff]  ;;  %v1041_v12 = vld [vmem:[%s2079_s8] sm:$0xff]  ;;  %v1649_v51 = vmov 920167782  }
  0x19   : > { %s382_s26 = scalar_lea.vmem %s2086_s0, %s1385_s18  ;;  %v701_v9 = vld [vmem:[%s2075_s4 + $0x8] sm:$0xff]  ;;  %v692_v13 = vld [vmem:[%s2074_s3] sm:$0xff]  ;;  %v707_v14 = vld [vmem:[%s2075_s4 + $0x38] sm:$0xff]  ;;  %v1650_v54 = vmov 1326507024   ;;  %s1326_s15 = sshll.u32 %s378_s14, 4  ;;  %s1327_s15 = int_to_ptr.vmem [resolvable:$true] %s1326_s15 }
  0x1a   : > { %v383_v5 = vld [vmem:[%s382_s26] sm:$0xf]  ;;  %v907_v11 = vld [vmem:[%s2077_s6 + $0x8] sm:$0xff]  ;;  %1459 = vmatprep.mubr.msk.f32.mxu1 %vm748_vm2, %v692_v13  ;;  %745 = vperm.xlu1 %1570, %v707_v14   ;;  %v706_v15 = vld [vmem:[%s2075_s4 + $0x30] sm:$0xff]  ;;  %v1651_v58 = vmov 683565275   ;;  %s1324_s18 = scalar_lea.hbm %s2082_s11, %s1415_s13 }
  0x1b   : > { %1450 = vmatprep.subr.msk.mxu0 %vm405_vm1, %v383_v5  ;;  %v704_v16 = vld [vmem:[%s2075_s4 + $0x20] sm:$0xff]  ;;  %v702_v18 = vld [vmem:[%s2075_s4 + $0x10] sm:$0xff]  ;;  %v1652_v60 = vmov 2475754826   ;;  %v1653_v2 = vmov 2131351028  }
  0x1c   : > { %390 = vperm.xlu0 %1569, %v386_v4   ;;  %1451 = vmatpush3.msk.msra.mxu0 %vm405_vm1, %v383_v5  ;;  %v700_v21 = vld [vmem:[%s2075_s4] sm:$0xff]  ;;  %v908_v29 = vld [vmem:[%s2077_s6 + $0x10] sm:$0xff]  ;;  %s1585_s25 = scalar_lea.vmem %s1327_s15, 16  ;;  %s1656_s26 = smov [#allocation3]  }
  0x1d   : > { %1453 = vmatmul.mubr.msk.f32.vlgmr.msra.gmra.mxu0 %vm398_vm0, %v385_v6  ;;  %v906_v36 = vld [vmem:[%s2077_s6] sm:$0xff]  ;;  %p1586_p11 = scmp.ne.s32.totalorder %s1327_s15, %s1585_s25  ;;  %s1589_s30 = sshll.u32 %s1656_s26, 4  ;;  %s1590_s30 = int_to_ptr.vmem [resolvable:$false] %s1589_s30 }
  0x1e   : > { %740 = vperm.xlu1 %1570, %v706_v15   ;;  %v1226_v42 = vld [vmem:[#allocation2] sm:$0x1]  ;;  %s1591_s10 = scalar_lea.vmem %s1590_s30, 32  ;;  %p1592_p0 = scmp.lt.s32.totalorder %s1327_s15, %s1590_s30 }
  0x1f   : > { %p1587_p12 = pnand %p1586_p11, %p1758_p5  ;;  %p1593_p1 = scmp.lt.s32.totalorder %s1591_s10, %s1585_s25 }
  0x20   : > { %735 = vperm.xlu0 %1569, %v705_v7  }
  0x21   : > { %p1588_p13 = pneg %p1587_p12  ;;  %p1594_p2 = por %p1593_p1, %p1592_p0 }
  0x22   : > { %730 = vperm.xlu1 %1570, %v704_v16  }
  0x23   : > { %p1595_p3 = pnand %p1594_p2, %p1588_p13 }
  0x24   : > { %725 = vperm.xlu0 %1569, %v703_v8  }
  0x26   : > { %720 = vperm.xlu1 %1570, %v702_v18  }
  0x28   : > { %715 = vperm.xlu0 %1569, %v701_v9  }
  0x2a   : > { %710 = vperm.xlu1 %1570, %v700_v21  }
  0x2c   : > { %927 = vperm.xlu0 %1569, %v909_v10  }
  0x2e   : > { %922 = vperm.xlu1 %1570, %v908_v29  }
  0x30   : > { %917 = vperm.xlu0 %1569, %v907_v11  }
  0x32   : > { %912 = vperm.xlu1 %1570, %v906_v36  }
  0x34   : > { %1044 = vperm.xlu0 %1569, %v1041_v12  }
  0x36   : > { %1229 = vperm.xlu1 %1570, %v1226_v42  }
  0x93   : > { %v396_v17 = vpop.permute.xlu0 %395 }
  0x97   : > { %v391_v22 = vpop.permute.xlu0 %390 }
  0xdd   : > { %v1454_v19 = vpop.f32.mrf.mxu0 }
  0xde   : > { %v1821_v20 = vadd.f32 %v1454_v19, %v396_v17 }
  0xdf   : > { %v475_v23 = vpop.f32.mrf.mxu0 }
  0xe0   : > { %v591_v24 = vand.u32 2139095040, %v1821_v20  ;;  %v1827_v25 = vadd.f32 %v475_v23, %v391_v22  ;;  %v588_v33 = vand.u32 2147483647, %v1821_v20 }
  0xe2   : > { %v592_v26 = vshrl.u32 %v591_v24, 23  ;;  %v484_v27 = vand.u32 2147483647, %v1827_v25  ;;  %v487_v28 = vand.u32 2139095040, %v1827_v25  ;;  %v1842_v40 = vand.u32 8388607, %v588_v33 }
  0xe3   : > { %vm486_vm1 = vcmp.lt.s32.totalorder %v1827_v25, 0 }
  0xe4   : > { %v1393_v30 = vadd.s32 4294967169, %v592_v26  ;;  %v488_v31 = vshrl.u32 %v487_v28, 23  ;;  %v491_v32 = vand.u32 8388607, %v484_v27  ;;  %v596_v50 = vor.u32 8388608, %v1842_v40 }
  0xe6   : > { %v598_v34 = vadd.s32 1, %v1393_v30  ;;  %v1389_v35 = vadd.s32 4294967169, %v488_v31  ;;  %v492_v39 = vor.u32 8388608, %v491_v32 }
  0xe8   : > { %vm599_vm3 = vcmp.gt.s32.totalorder %v598_v34, 0  ;;  %v494_v37 = vadd.s32 1, %v1389_v35  ;;  %v1853_v49 = vshll.u32 %v492_v39, 8 }
  0xe9   : > { %v600_v38 = vsel %vm599_vm3, %v598_v34, 0  ;;  %vm1936_vm3 = vcmp.le.f32.partialorder %v484_v27, 0.7853982 }
  0xea   : > { %v1844_v41 = vand.u32 31, %v600_v38  ;;  %vm495_vm4 = vcmp.gt.s32.totalorder %v494_v37, 0  ;;  %v1846_v43 = vshrl.u32 %v600_v38, 5 }
  0xeb   : > { %v496_v44 = vsel %vm495_vm4, %v494_v37, 0  ;;  %vm590_vm4 = vcmp.lt.s32.totalorder %v1821_v20, 0 }
  0xec   : > { %v1849_v45 = vsub.s32 32, %v1844_v41  ;;  %v614_v47 = vshll.u32 %v1648_v46, %v1844_v41  ;;  %v498_v48 = vand.u32 31, %v496_v44  ;;  %v617_v53 = vshll.u32 %v1649_v51, %v1844_v41 }
  0xed   : > { %v497_v56 = vshrl.u32 %v496_v44, 5  ;;  %vm623_vm5 = vcmp.lt.s32.totalorder %v1846_v43, 4  ;;  %v605_v59 = vshll.u32 %v1651_v58, %v1844_v41  ;;  %v608_v62 = vshll.u32 %v1652_v60, %v1844_v41 }
  0xee   : > { %v615_v52 = vshrl.u32 %v1649_v51, %v1849_v45  ;;  %v618_v55 = vshrl.u32 %v1650_v54, %v1849_v45  ;;  %v499_v57 = vsub.s32 32, %v498_v48  ;;  %v606_v61 = vshrl.u32 %v1652_v60, %v1849_v45 }
  0xef   : > { %v501_v0 = vshll.u32 %v1651_v58, %v498_v48  ;;  %v504_v1 = vshll.u32 %v1652_v60, %v498_v48  ;;  %v507_v3 = vshll.u32 %v1653_v2, %v498_v48  ;;  %v510_v8 = vshll.u32 %v1648_v46, %v498_v48 }
  0xf0   : > { %v616_v63 = vor.u32 %v615_v52, %v614_v47  ;;  %v619_v4 = vor.u32 %v618_v55, %v617_v53  ;;  %v502_v5 = vshrl.u32 %v1652_v60, %v499_v57  ;;  %v505_v6 = vshrl.u32 %v1653_v2, %v499_v57 }
  0xf1   : > { %v508_v7 = vshrl.u32 %v1648_v46, %v499_v57  ;;  %v511_v9 = vshrl.u32 %v1649_v51, %v499_v57  ;;  %v513_v10 = vshll.u32 %v1649_v51, %v498_v48  ;;  %v514_v11 = vshrl.u32 %v1650_v54, %v499_v57 }
  0xf2   : > { %v500_v12 = vshrl.u32 %v1651_v58, %v499_v57  ;;  %v503_v13 = vor.u32 %v502_v5, %v501_v0  ;;  %v506_v14 = vor.u32 %v505_v6, %v504_v1  ;;  %vm516_vm6 = vcmp.lt.s32.totalorder %v497_v56, 1 }
  0xf3   : > { %v509_v15 = vor.u32 %v508_v7, %v507_v3  ;;  %v512_v16 = vor.u32 %v511_v9, %v510_v8  ;;  %v515_v17 = vor.u32 %v514_v11, %v513_v10  ;;  %vm517_vm7 = vcmp.lt.s32.totalorder %v497_v56, 2 }
  0xf4   : > { %vm518_vm8 = vcmp.lt.s32.totalorder %v497_v56, 3  ;;  %vm519_vm9 = vcmp.lt.s32.totalorder %v497_v56, 4  ;;  %v524_v18 = vsel %vm516_vm6, %v503_v13, %v506_v14  ;;  %v520_v21 = vsel %vm516_vm6, %v500_v12, %v503_v13 }
  0xf5   : > { %v528_v19 = vsel %vm516_vm6, %v506_v14, %v509_v15  ;;  %v521_v22 = vsel %vm519_vm9, %v509_v15, 2102212464  ;;  %v525_v23 = vsel %vm519_vm9, %v512_v16, 920167782  ;;  %v529_v24 = vsel %vm519_vm9, %v515_v17, 1326507024 }
  0xf6   : > { %v522_v26 = vsel %vm518_vm8, %v506_v14, %v521_v22  ;;  %v526_v28 = vsel %vm518_vm8, %v509_v15, %v525_v23  ;;  %v530_v29 = vsel %vm518_vm8, %v512_v16, %v529_v24  ;;  %v609_v30 = vshrl.u32 %v1653_v2, %v1849_v45 }
  0xf7   : > { %v633_v31 = vsel %vm623_vm5, %v619_v4, 1326507024  ;;  %v527_v32 = vsel %vm517_vm7, %v524_v18, %v526_v28  ;;  %v531_v34 = vsel %vm517_vm7, %v528_v19, %v530_v29  ;;  %v607_v35 = vor.u32 %v606_v61, %v605_v59 }
  0xf8   : > { %v1887_v36 = vmul.u32.u64.low %v1853_v49, %v531_v34  ;;  %v1888_v37 = vmul.u32.u64.high %v1853_v49, %v531_v34, %v1887_v36  ;;  %v1891_v38 = vmul.u32.u64.low %v1853_v49, %v527_v32  ;;  %v1892_v39 = vmul.u32.u64.high %v1853_v49, %v527_v32, %v1891_v38 }
  0xf9   : > { %v523_v42 = vsel %vm517_vm7, %v520_v21, %v522_v26  ;;  %v610_v44 = vor.u32 %v609_v30, %v608_v62  ;;  %v611_v47 = vshll.u32 %v1653_v2, %v1844_v41  ;;  %v612_v48 = vshrl.u32 %v1648_v46, %v1849_v45 }
  0xfa   : > { %v629_v52 = vsel %vm623_vm5, %v616_v63, 920167782  ;;  %vm620_vm10 = vcmp.lt.s32.totalorder %v1846_v43, 1  ;;  %vm622_vm11 = vcmp.lt.s32.totalorder %v1846_v43, 3  ;;  %v636_v57 = vshll.u32 %v596_v50, 8 }
  0xfb   : > { %v613_v53 = vor.u32 %v612_v48, %v611_v47  ;;  %v628_v55 = vsel %vm620_vm10, %v607_v35, %v610_v44  ;;  %v634_v56 = vsel %vm622_vm11, %v616_v63, %v633_v31  ;;  %v539_v41 = vmul.u32 %v1853_v49, %v523_v42 }
  0xfc   : > { %vm541_vm12 = vc.u32 %v1888_v37, %v1891_v38  ;;  %v542_v59 = vadd.s32 1, %v1892_v39  ;;  %v604_v61 = vshrl.u32 %v1651_v58, %v1849_v45  ;;  %vm621_vm13 = vcmp.lt.s32.totalorder %v1846_v43, 2 }
  0xfd   : > { %v625_v62 = vsel %vm623_vm5, %v613_v53, 2102212464  ;;  %v630_v63 = vsel %vm622_vm11, %v613_v53, %v629_v52  ;;  %v632_v0 = vsel %vm620_vm10, %v610_v44, %v613_v53  ;;  %v540_v29 = vadd.s32 %v1891_v38, %v1888_v37 }
  0xfe   : > { %v543_v40 = vsel %vm541_vm12, %v542_v59, %v1892_v39  ;;  %v624_v50 = vsel %vm620_vm10, %v604_v61, %v607_v35  ;;  %v631_v49 = vsel %vm621_vm13, %v628_v55, %v630_v63  ;;  %v635_v1 = vsel %vm621_vm13, %v632_v0, %v634_v56 }
  0xff   : > { %v544_v3 = vadd.s32 %v543_v40, %v539_v41  ;;  %v626_v4 = vsel %vm622_vm11, %v610_v44, %v625_v62  ;;  %v1920_v5 = vmul.u32.u64.low %v636_v57, %v635_v1  ;;  %v1921_v45 = vmul.u32.u64.high %v636_v57, %v635_v1, %v1920_v5 }
 0x100   : > { %v1923_v6 = vmul.u32.u64.low %v636_v57, %v631_v49  ;;  %v1924_v7 = vmul.u32.u64.high %v636_v57, %v631_v49, %v1923_v6  ;;  %v627_v9 = vsel %vm621_vm13, %v624_v50, %v626_v4  ;;  %vm589_vm5 = vcmp.le.f32.partialorder %v588_v33, 0.7853982 }
 0x101   : > { %v545_v8 = vadd.s32 536870912, %v544_v3  ;;  %v643_v13 = vmul.u32 %v636_v57, %v627_v9  ;;  %vm680_vm12 = vweird.f32 %v1821_v20  ;;  %vm576_vm13 = vweird.f32 %v1827_v25 }
 0x102   : > { %vm645_vm14 = vc.u32 %v1921_v45, %v1923_v6  ;;  %v646_v11 = vadd.s32 1, %v1924_v7  ;;  %v644_v52 = vadd.s32 %v1923_v6, %v1921_v45 }
 0x103   : > { %v546_v10 = vshrl.u32 %v545_v8, 30 }
 0x104   : > { %v647_v14 = vsel %vm645_vm14, %v646_v11, %v1924_v7  ;;  %vm930_vm14 = vcmask 523264  }
 0x105   : > { %v547_v12 = vshll.u32 %v546_v10, 30  ;;  %v648_v43 = vadd.s32 %v647_v14, %v643_v13  ;;  %v570_v45 = vsub.s32 4, %v546_v10 }
 0x107   : > { %v548_v15 = vsub.s32 %v544_v3, %v547_v12  ;;  %v649_v17 = vadd.s32 536870912, %v648_v43  ;;  %v571_v8 = vsel %vm486_vm1, %v570_v45, %v546_v10 }
 0x108   : > { %v573_v12 = vsel %vm1936_vm3, 0, %v571_v8 }
 0x109   : > { %v550_v16 = vsub.s32 0, %v548_v15  ;;  %v650_v19 = vshrl.u32 %v649_v17, 30  ;;  %v577_v14 = vadd.s32 3, %v573_v12 }
 0x10b   : > { %v1390_v18 = vmin.u32 %v550_v16, %v548_v15  ;;  %v651_v22 = vshll.u32 %v650_v19, 30  ;;  %v674_v7 = vsub.s32 4, %v650_v19  ;;  %v578_v17 = vand.u32 3, %v577_v14 }
 0x10d   : > { %v552_v21 = vclz %v1390_v18  ;;  %v652_v24 = vsub.s32 %v648_v43, %v651_v22  ;;  %v675_v11 = vsel %vm590_vm4, %v674_v7, %v650_v19  ;;  %vm580_vm6 = vcmp.eq.s32.totalorder %v578_v17, 0 }
 0x10e   : > { %v677_v13 = vsel %vm589_vm5, 0, %v675_v11  ;;  %vm583_vm7 = vcmp.eq.s32.totalorder %v578_v17, 2  ;;  %vm579_vm9 = vcmp.lt.s32.totalorder %v578_v17, 2 }
 0x10f   : > { %v1391_v23 = vadd.s32 4294967294, %v552_v21  ;;  %v654_v26 = vsub.s32 0, %v652_v24  ;;  %v681_v16 = vadd.s32 3, %v677_v13 }
 0x111   : > { %vm1392_vm15 = vcmp.lt.s32.totalorder %v1391_v23, 0  ;;  %v1394_v32 = vmin.u32 %v654_v26, %v652_v24  ;;  %v682_v21 = vand.u32 3, %v681_v16 }
 0x112   : > { %v555_v28 = vsel %vm1392_vm15, 0, %v1391_v23 }
 0x113   : > { %v556_v30 = vsub.s32 32, %v555_v28  ;;  %v560_v31 = vsub.s32 4294967266, %v555_v28  ;;  %v557_v34 = vshll.u32 %v548_v15, %v555_v28  ;;  %v656_v39 = vclz %v1394_v32 }
 0x114   : > { %vm687_vm8 = vcmp.eq.s32.totalorder %v682_v21, 2  ;;  %vm684_vm10 = vcmp.eq.s32.totalorder %v682_v21, 0  ;;  %vm683_vm11 = vcmp.lt.s32.totalorder %v682_v21, 2 }
 0x115   : > { %v558_v35 = vshrl.u32 %v540_v29, %v556_v30  ;;  %v561_v36 = vadd.s32 127, %v560_v31  ;;  %v1395_v47 = vadd.s32 4294967294, %v656_v39  ;;  %v697_v39 = vld [vmem:[%s2074_s3 + $0x28] sm:$0xff] }
 0x117   : > { %v559_v42 = vor.u32 %v558_v35, %v557_v34  ;;  %v562_v44 = vshll.u32 %v561_v36, 23  ;;  %vm1396_vm0 = vcmp.lt.s32.totalorder %v1395_v47, 0  ;;  %v693_v35 = vld [vmem:[%s2074_s3 + $0x8] sm:$0xff]  ;;  %v694_v36 = vld [vmem:[%s2074_s3 + $0x10] sm:$0xff] }
 0x118   : > { %v659_v53 = vsel %vm1396_vm0, 0, %v1395_v47  ;;  %v902_v47 = vld [vmem:[%s2076_s5] sm:$0xff] }
 0x119   : > { %v563_v48 = vor.u32 4788187, %v562_v44  ;;  %v566_v56 = vcvt.s32.f32 %v559_v42  ;;  %v660_v57 = vsub.s32 32, %v659_v53  ;;  %v664_v41 = vsub.s32 4294967266, %v659_v53  ;;  %v698_v42 = vld [vmem:[%s2074_s3 + $0x30] sm:$0xff]  ;;  %v699_v44 = vld [vmem:[%s2074_s3 + $0x38] sm:$0xff]  ;;  %1487 = vmatprep.mubr.msk.f32.mxu0 %vm930_vm14, %v902_v47 }
 0x11a   : > { %v661_v38 = vshll.u32 %v652_v24, %v659_v53 }
 0x11b   : > { %v564_v55 = vand.u32 2147483647, %v563_v48  ;;  %v662_v59 = vshrl.u32 %v644_v52, %v660_v57  ;;  %v665_v61 = vadd.s32 127, %v664_v41  ;;  %v746_v48 = vpop.permute.xlu1 %745  ;;  %v736_v41 = vpop.permute.xlu0 %735 }
 0x11d   : > { %v567_v37 = vmul.f32 %v566_v56, %v564_v55  ;;  %v663_v63 = vor.u32 %v662_v59, %v661_v38  ;;  %v666_v0 = vshll.u32 %v665_v61, 23 }
 0x11f   : > { %v568_v62 = vxor.u32 2147483648, %v567_v37  ;;  %v667_v50 = vor.u32 4788187, %v666_v0  ;;  %v670_v4 = vcvt.s32.f32 %v663_v63  ;;  %v741_v55 = vpop.permute.xlu1 %740  ;;  %v726_v0 = vpop.permute.xlu0 %725 }
 0x121   : > { %v569_v40 = vsel %vm486_vm1, %v568_v62, %v567_v37  ;;  %v668_v3 = vand.u32 2147483647, %v667_v50 }
 0x122   : > { %v572_v1 = vsel %vm1936_vm3, %v1827_v25, %v569_v40  ;;  %v696_v25 = vld [vmem:[%s2074_s3 + $0x20] sm:$0xff] }
 0x123   : > { %1571 = vcosq.f32 %v572_v1  ;;  %v671_v5 = vmul.f32 %v670_v4, %v668_v3  ;;  %v731_v38 = vpop.permute.xlu1 %730 }
 0x124   : > { %1573 = vsinq.f32 %v572_v1 }
 0x125   : > { %v672_v6 = vxor.u32 2147483648, %v671_v5 }
 0x127   : > { %v673_v27 = vsel %vm590_vm4, %v672_v6, %v671_v5  ;;  %v721_v3 = vpop.permute.xlu1 %720 }
 0x128   : > { %v676_v9 = vsel %vm589_vm5, %v1821_v20, %v673_v27  ;;  %v695_v20 = vld [vmem:[%s2074_s3 + $0x18] sm:$0xff] }
 0x129   : > { %1575 = vcosq.f32 %v676_v9 }
 0x12a   : > { %1577 = vsinq.f32 %v676_v9  ;;  %v716_v9 = vpop.permute.xlu0 %715 }
 0x12b   : > { %v711_v14 = vpop.permute.xlu1 %710 }
 0x130   : > { %v1572_v15 = vpop.eup %1571 }
 0x131   : > { %v1574_v43 = vpop.eup %1573  ;;  %v584_v33 = vxor.u32 2147483648, %v1572_v15 }
 0x132   : > { %v581_v18 = vxor.u32 2147483648, %v1574_v43 }
 0x133   : > { %v585_v23 = vsel %vm583_vm7, %v584_v33, %v1574_v43  ;;  %vm1655_vm7 = vmmov 0  }
 0x134   : > { %v582_v22 = vsel %vm580_vm6, %v1572_v15, %v581_v18 }
 0x135   : > { %v586_v29 = vsel %vm579_vm9, %v582_v22, %v585_v23  ;;  %v903_v23 = vld [vmem:[%s2076_s5 + $0x8] sm:$0xff] }
 0x136   : > { %v1576_v10 = vpop.eup %1575  ;;  %v587_v34 = vsel %vm576_vm13, nan, %v586_v29  ;;  %v923_v29 = vpop.permute.xlu1 %922 }
 0x137   : > { %v1578_v24 = vpop.eup %1577  ;;  %v688_v19 = vxor.u32 2147483648, %v1576_v10 }
 0x138   : > { %v685_v26 = vxor.u32 2147483648, %v1578_v24 }
 0x139   : > { %v689_v28 = vsel %vm687_vm8, %v688_v19, %v1578_v24  ;;  %v904_v24 = vld [vmem:[%s2076_s5 + $0x10] sm:$0xff]  ;;  %v905_v19 = vld [vmem:[%s2076_s5 + $0x18] sm:$0xff] }
 0x13a   : > { %v686_v30 = vsel %vm684_vm10, %v1576_v10, %v685_v26  ;;  %v1654_v26 = vmov 0.0  }
 0x13b   : > { %v690_v31 = vsel %vm683_vm11, %v686_v30, %v689_v28  ;;  %v928_v28 = vpop.permute.xlu0 %927 }
 0x13c   : > { %v691_v32 = vsel %vm680_vm12, nan, %v690_v31  ;;  %vm1047_vm12 = vcmask 261120  }
 0x13d   : > { %1455 = vmatprep.subr.mxu1 %v691_v32 }
 0x13e   : > { %1456 = vmatpush3.msra.mxu1 %v691_v32 }
 0x13f   : > { %1457 = vmatprep.subr.mxu1 %v587_v34  ;;  %v918_v32 = vpop.permute.xlu0 %917 }
 0x140   : > { %1458 = vmatpush3.msra.mxu1 %v587_v34 }
 0x141   : > { %1460 = vmatmul.mubr.msk.f32.vlgmr.msra.gmra.mxu1 %vm748_vm2, %v693_v35  ;;  %1493 = vmatprep.subr.mxu1 %v1654_v26 }
 0x142   : > { %1462 = vmatprep.mubr.msk.f32.mxu1 %vm748_vm2, %v694_v36 }
 0x145   : > { %1463 = vmatmul.mubr.msk.f32.gmra.mxu1 %vm748_vm2, %v695_v20  ;;  %v913_v20 = vpop.permute.xlu1 %912 }
 0x146   : > { %1465 = vmatprep.mubr.msk.f32.mxu1 %vm748_vm2, %v696_v25 }
 0x149   : > { %1466 = vmatmul.mubr.msk.f32.gmra.mxu1 %vm748_vm2, %v697_v39 }
 0x14a   : > { %1468 = vmatprep.mubr.msk.f32.mxu1 %vm748_vm2, %v698_v42 }
 0x14d   : > { %1469 = vmatmul.mubr.msk.f32.gmra.mxu1 %vm748_vm2, %v699_v44 }
 0x14e   : > { %1501 = vmatprep.mubr.msk.f32.mxu1 %vm1655_vm7, %v1654_v26 }
 0x201   : > { %v1461_v52 = vpop.f32.mrf.mxu1 }
 0x202   : > { %v845_v11 = vadd.f32 %v1461_v52, %v716_v9 }
 0x203   : > { %v839_v53 = vpop.f32.mrf.mxu1 }
 0x204   : > { %v840_v15 = vadd.f32 %v839_v53, %v711_v14  ;;  %v887_v17 = vmul.f32 0.01, %v845_v11  ;;  %vm879_vm5 = vcmp.gt.f32.partialorder %v845_v11, 0.0 }
 0x205   : > { %v1464_v56 = vpop.f32.mrf.mxu1 }
 0x206   : > { %v855_v4 = vadd.f32 %v1464_v56, %v726_v0  ;;  %v886_v33 = vmul.f32 0.01, %v840_v15  ;;  %vm878_vm6 = vcmp.gt.f32.partialorder %v840_v15, 0.0  ;;  %v895_v10 = vsel %vm879_vm5, %v845_v11, %v887_v17 }
 0x207   : > { %v849_v57 = vpop.f32.mrf.mxu1 }
 0x208   : > { %v850_v7 = vadd.f32 %v849_v57, %v721_v3  ;;  %v889_v12 = vmul.f32 0.01, %v855_v4  ;;  %vm881_vm3 = vcmp.gt.f32.partialorder %v855_v4, 0.0  ;;  %v894_v22 = vsel %vm878_vm6, %v840_v15, %v886_v33  ;;  %v1040_v57 = vld [vmem:[%s2078_s7] sm:$0xff] }
 0x209   : > { %v1467_v37 = vpop.f32.mrf.mxu1 }
 0x20a   : > { %v865_v62 = vadd.f32 %v1467_v37, %v736_v41  ;;  %v888_v43 = vmul.f32 0.01, %v850_v7  ;;  %vm880_vm4 = vcmp.gt.f32.partialorder %v850_v7, 0.0  ;;  %v897_v18 = vsel %vm881_vm3, %v855_v4, %v889_v12  ;;  %v1045_v37 = vpop.permute.xlu0 %1044 }
 0x20b   : > { %v859_v59 = vpop.f32.mrf.mxu1 }
 0x20c   : > { %v860_v50 = vadd.f32 %v859_v59, %v731_v38  ;;  %v891_v5 = vmul.f32 0.01, %v865_v62  ;;  %vm883_vm0 = vcmp.gt.f32.partialorder %v865_v62, 0.0  ;;  %v896_v21 = vsel %vm880_vm4, %v850_v7, %v888_v43 }
 0x20d   : > { %v1470_v61 = vpop.f32.mrf.mxu1 }
 0x20e   : > { %v875_v63 = vadd.f32 %v1470_v61, %v746_v48  ;;  %v890_v27 = vmul.f32 0.01, %v860_v50  ;;  %vm882_vm1 = vcmp.gt.f32.partialorder %v860_v50, 0.0  ;;  %v899_v13 = vsel %vm883_vm0, %v865_v62, %v891_v5 }
 0x20f   : > { %v869_v40 = vpop.f32.mrf.mxu1 }
 0x210   : > { %v893_v49 = vmul.f32 0.01, %v875_v63  ;;  %v870_v1 = vadd.f32 %v869_v40, %v741_v55  ;;  %vm885_vm2 = vcmp.gt.f32.partialorder %v875_v63, 0.0  ;;  %v898_v16 = vsel %vm882_vm1, %v860_v50, %v890_v27 }
 0x212   : > { %v892_v45 = vmul.f32 0.01, %v870_v1  ;;  %v901_v6 = vsel %vm885_vm2, %v875_v63, %v893_v49  ;;  %vm884_vm15 = vcmp.gt.f32.partialorder %v870_v1, 0.0 }
 0x213   : > { %1471 = vmatprep.subr.mxu0 %v901_v6 }
 0x214   : > { %1472 = vmatpush3.msra.mxu0 %v901_v6  ;;  %v900_v8 = vsel %vm884_vm15, %v870_v1, %v892_v45 }
 0x215   : > { %1473 = vmatprep.subr.mxu0 %v900_v8 }
 0x216   : > { %1474 = vmatpush3.msra.mxu0 %v900_v8 }
 0x217   : > { %1475 = vmatprep.subr.mxu0 %v899_v13 }
 0x218   : > { %1476 = vmatpush3.msra.mxu0 %v899_v13 }
 0x219   : > { %1477 = vmatprep.subr.mxu0 %v898_v16 }
 0x21a   : > { %1478 = vmatpush3.msra.mxu0 %v898_v16 }
 0x21b   : > { %1479 = vmatprep.subr.mxu0 %v897_v18 }
 0x21c   : > { %1480 = vmatpush3.msra.mxu0 %v897_v18 }
 0x21d   : > { %1481 = vmatprep.subr.mxu0 %v896_v21 }
 0x21e   : > { %1482 = vmatpush3.msra.mxu0 %v896_v21 }
 0x21f   : > { %1483 = vmatprep.subr.mxu0 %v895_v10 }
 0x220   : > { %1484 = vmatpush3.msra.mxu0 %v895_v10 }
 0x221   : > { %1485 = vmatprep.subr.mxu0 %v894_v22 }
 0x222   : > { %1486 = vmatpush3.msra.mxu0 %v894_v22 }
 0x223   : > { %1488 = vmatmul.mubr.msk.f32.vlgmr.msra.gmra.mxu0 %vm930_vm14, %v903_v23 }
 0x224   : > { %1490 = vmatprep.mubr.msk.f32.mxu0 %vm930_vm14, %v904_v24 }
 0x227   : > { %1491 = vmatmul.mubr.msk.f32.gmra.mxu0 %vm930_vm14, %v905_v19 }
 0x2e3   : > { %v1489_v30 = vpop.f32.mrf.mxu0 }
 0x2e4   : > { %v1015_v35 = vadd.f32 %v1489_v30, %v918_v32 }
 0x2e5   : > { %v1009_v31 = vpop.f32.mrf.mxu0 }
 0x2e6   : > { %v1010_v39 = vadd.f32 %v1009_v31, %v913_v20  ;;  %v1033_v47 = vmul.f32 0.01, %v1015_v35  ;;  %vm1029_vm10 = vcmp.gt.f32.partialorder %v1015_v35, 0.0 }
 0x2e7   : > { %v1492_v34 = vpop.f32.mrf.mxu0 }
 0x2e8   : > { %v1025_v36 = vadd.f32 %v1492_v34, %v928_v28  ;;  %v1032_v53 = vmul.f32 0.01, %v1010_v39  ;;  %vm1028_vm11 = vcmp.gt.f32.partialorder %v1010_v39, 0.0  ;;  %v1037_v56 = vsel %vm1029_vm10, %v1015_v35, %v1033_v47 }
 0x2e9   : > { %v1019_v25 = vpop.f32.mrf.mxu0  ;;  %vm1236_vm10 = vcmask 64512  }
 0x2ea   : > { %vm1031_vm8 = vcmp.gt.f32.partialorder %v1025_v36, 0.0  ;;  %v1035_v42 = vmul.f32 0.01, %v1025_v36  ;;  %v1020_v44 = vadd.f32 %v1019_v25, %v923_v29  ;;  %v1036_v41 = vsel %vm1028_vm11, %v1010_v39, %v1032_v53 }
 0x2ec   : > { %vm1030_vm9 = vcmp.gt.f32.partialorder %v1020_v44, 0.0  ;;  %v1034_v48 = vmul.f32 0.01, %v1020_v44  ;;  %v1039_v52 = vsel %vm1031_vm8, %v1025_v36, %v1035_v42 }
 0x2ed   : > { %1494 = vmatpush3.msra.mxu1 %v1039_v52 }
 0x2ee   : > { %1495 = vmatprep.subr.mxu1 %v1654_v26  ;;  %v1038_v55 = vsel %vm1030_vm9, %v1020_v44, %v1034_v48 }
 0x2ef   : > { %1496 = vmatpush3.msra.mxu1 %v1038_v55 }
 0x2f0   : > { %1497 = vmatprep.subr.mxu1 %v1654_v26 }
 0x2f1   : > { %1498 = vmatpush3.msra.mxu1 %v1037_v56 }
 0x2f2   : > { %1499 = vmatprep.subr.mxu1 %v1654_v26 }
 0x2f3   : > { %1500 = vmatpush3.msra.mxu1 %v1036_v41 }
 0x2f4   : > { %1502 = vmatmul.mubr.msk.f32.vlgmr.msra.gmra.mxu1 %vm1047_vm12, %v1040_v57  ;;  %1504 = vmatprep.subr.mxu1 %v1654_v26 }
 0x2f5   : > { %1506 = vmatprep.mubr.msk.f32.mxu1 %vm1655_vm7, %v1654_v26 }
 0x3b4   : > { %v1117_v38 = vpop.f32.mrf.mxu1 }
 0x3b5   : > { %v2002_v59 = vadd.f32 %v1117_v38, %v1045_v37 }
 0x3b6   : > { %v1503_v61 = vpop.f32.mrf.mxu1 }
 0x3b7   : > { %v1124_v62 = vand.u32 2139095040, %v2002_v59  ;;  %v1121_v50 = vand.u32 2147483647, %v2002_v59  ;;  %vm1123_vm4 = vcmp.lt.s32.totalorder %v2002_v59, 0  ;;  %vm1213_vm9 = vweird.f32 %v2002_v59 }
 0x3b9   : > { %v1125_v63 = vshrl.u32 %v1124_v62, 23  ;;  %v1128_v3 = vand.u32 8388607, %v1121_v50  ;;  %vm1122_vm5 = vcmp.le.f32.partialorder %v1121_v50, 0.7853982 }
 0x3bb   : > { %v1410_v0 = vadd.s32 4294967169, %v1125_v63  ;;  %v1129_v15 = vor.u32 8388608, %v1128_v3 }
 0x3bd   : > { %v1131_v40 = vadd.s32 1, %v1410_v0 }
 0x3bf   : > { %vm1132_vm13 = vcmp.gt.s32.totalorder %v1131_v40, 0 }
 0x3c0   : > { %v1133_v49 = vsel %vm1132_vm13, %v1131_v40, 0 }
 0x3c1   : > { %v1135_v1 = vand.u32 31, %v1133_v49  ;;  %v1134_v5 = vshrl.u32 %v1133_v49, 5 }
 0x3c3   : > { %v1136_v4 = vsub.s32 32, %v1135_v1  ;;  %v1138_v45 = vshll.u32 %v1651_v58, %v1135_v1  ;;  %v1141_v6 = vshll.u32 %v1652_v60, %v1135_v1  ;;  %v1144_v8 = vshll.u32 %v1653_v2, %v1135_v1 }
 0x3c4   : > { %v1147_v11 = vshll.u32 %v1648_v46, %v1135_v1  ;;  %v1150_v13 = vshll.u32 %v1649_v51, %v1135_v1  ;;  %vm1153_vm14 = vcmp.lt.s32.totalorder %v1134_v5, 1  ;;  %vm1156_vm2 = vcmp.lt.s32.totalorder %v1134_v5, 4 }
 0x3c5   : > { %v1139_v7 = vshrl.u32 %v1652_v60, %v1136_v4  ;;  %v1142_v27 = vshrl.u32 %v1653_v2, %v1136_v4  ;;  %v1145_v9 = vshrl.u32 %v1648_v46, %v1136_v4  ;;  %v1148_v12 = vshrl.u32 %v1649_v51, %v1136_v4 }
 0x3c6   : > { %v1151_v14 = vshrl.u32 %v1650_v54, %v1136_v4  ;;  %v1137_v10 = vshrl.u32 %v1651_v58, %v1136_v4  ;;  %vm1155_vm15 = vcmp.lt.s32.totalorder %v1134_v5, 3  ;;  %vm1154_vm0 = vcmp.lt.s32.totalorder %v1134_v5, 2 }
 0x3c7   : > { %v1140_v43 = vor.u32 %v1139_v7, %v1138_v45  ;;  %v1143_v16 = vor.u32 %v1142_v27, %v1141_v6  ;;  %v1146_v17 = vor.u32 %v1145_v9, %v1144_v8  ;;  %v1149_v18 = vor.u32 %v1148_v12, %v1147_v11 }
 0x3c8   : > { %v1152_v60 = vor.u32 %v1151_v14, %v1150_v13  ;;  %v1169_v54 = vshll.u32 %v1129_v15, 8 }
 0x3c9   : > { %v1158_v33 = vsel %vm1156_vm2, %v1146_v17, 2102212464  ;;  %v1161_v2 = vsel %vm1153_vm14, %v1140_v43, %v1143_v16  ;;  %v1165_v21 = vsel %vm1153_vm14, %v1143_v16, %v1146_v17  ;;  %v1162_v46 = vsel %vm1156_vm2, %v1149_v18, 920167782 }
 0x3ca   : > { %v1166_v22 = vsel %vm1156_vm2, %v1152_v60, 1326507024  ;;  %v1163_v51 = vsel %vm1155_vm15, %v1146_v17, %v1162_v46  ;;  %v1157_v24 = vsel %vm1153_vm14, %v1137_v10, %v1140_v43  ;;  %v1159_v19 = vsel %vm1155_vm15, %v1143_v16, %v1158_v33  ;;  %v1225_v43 = vld [vmem:[%s2080_s9] sm:$0x1]  ;;  %v1230_v33 = vpop.permute.xlu1 %1229 }
 0x3cb   : > { %v1167_v23 = vsel %vm1155_vm15, %v1149_v18, %v1166_v22  ;;  %v1164_v26 = vsel %vm1154_vm0, %v1161_v2, %v1163_v51  ;;  %v1160_v34 = vsel %vm1154_vm0, %v1157_v24, %v1159_v19  ;;  %v1232_v17 = vlaneseq }
 0x3cc   : > { %v1168_v28 = vsel %vm1154_vm0, %v1165_v21, %v1167_v23  ;;  %v2022_v31 = vmul.u32.u64.low %v1169_v54, %v1164_v26  ;;  %v2023_v32 = vmul.u32.u64.high %v1169_v54, %v1164_v26, %v2022_v31  ;;  %v1176_v35 = vmul.u32 %v1169_v54, %v1160_v34 }
 0x3cd   : > { %v2019_v29 = vmul.u32.u64.low %v1169_v54, %v1168_v28  ;;  %v2020_v30 = vmul.u32.u64.high %v1169_v54, %v1168_v28, %v2019_v29  ;;  %v1233_v18 = vshrl.u32 %v1232_v17, 7 }
 0x3ce   : > { %v1179_v58 = vadd.s32 1, %v2023_v32 }
 0x3cf   : > { %vm1178_vm1 = vc.u32 %v2020_v30, %v2022_v31  ;;  %v1177_v56 = vadd.s32 %v2022_v31, %v2020_v30  ;;  %v1234_v60 = vsub.s32 0, %v1233_v18 }
 0x3d0   : > { %v1180_v36 = vsel %vm1178_vm1, %v1179_v58, %v2023_v32 }
 0x3d1   : > { %v1181_v20 = vadd.s32 %v1180_v36, %v1176_v35  ;;  %v1235_v2 = vrot.slane %v1230_v33, %v1234_v60 }
 0x3d3   : > { %v1182_v25 = vadd.s32 536870912, %v1181_v20 }
 0x3d5   : > { %v1183_v39 = vshrl.u32 %v1182_v25, 30 }
 0x3d7   : > { %v1184_v42 = vshll.u32 %v1183_v39, 30  ;;  %v1207_v4 = vsub.s32 4, %v1183_v39 }
 0x3d9   : > { %v1185_v44 = vsub.s32 %v1181_v20, %v1184_v42  ;;  %v1208_v6 = vsel %vm1123_vm4, %v1207_v4, %v1183_v39 }
 0x3da   : > { %v1210_v7 = vsel %vm1122_vm5, 0, %v1208_v6 }
 0x3db   : > { %v1187_v47 = vsub.s32 0, %v1185_v44  ;;  %v1214_v27 = vadd.s32 3, %v1210_v7 }
 0x3dd   : > { %v1411_v48 = vmin.u32 %v1187_v47, %v1185_v44  ;;  %v1215_v8 = vand.u32 3, %v1214_v27 }
 0x3df   : > { %v1189_v52 = vclz %v1411_v48  ;;  %vm1220_vm6 = vcmp.eq.s32.totalorder %v1215_v8, 2  ;;  %vm1217_vm7 = vcmp.eq.s32.totalorder %v1215_v8, 0  ;;  %vm1216_vm8 = vcmp.lt.s32.totalorder %v1215_v8, 2 }
 0x3e1   : > { %v1412_v53 = vadd.s32 4294967294, %v1189_v52 }
 0x3e3   : > { %vm1413_vm3 = vcmp.lt.s32.totalorder %v1412_v53, 0 }
 0x3e4   : > { %v1192_v55 = vsel %vm1413_vm3, 0, %v1412_v53 }
 0x3e5   : > { %v1193_v57 = vsub.s32 32, %v1192_v55  ;;  %v1197_v41 = vsub.s32 4294967266, %v1192_v55  ;;  %v1194_v37 = vshll.u32 %v1185_v44, %v1192_v55 }
 0x3e7   : > { %v1195_v38 = vshrl.u32 %v1177_v56, %v1193_v57  ;;  %v1198_v61 = vadd.s32 127, %v1197_v41 }
 0x3e9   : > { %v1196_v62 = vor.u32 %v1195_v38, %v1194_v37  ;;  %v1199_v63 = vshll.u32 %v1198_v61, 23 }
 0x3eb   : > { %v1200_v0 = vor.u32 4788187, %v1199_v63  ;;  %v1203_v49 = vcvt.s32.f32 %v1196_v62 }
 0x3ed   : > { %v1201_v40 = vand.u32 2147483647, %v1200_v0 }
 0x3ef   : > { %v1204_v1 = vmul.f32 %v1203_v49, %v1201_v40 }
 0x3f1   : > { %v1205_v3 = vxor.u32 2147483648, %v1204_v1 }
 0x3f3   : > { %v1206_v5 = vsel %vm1123_vm4, %v1205_v3, %v1204_v1 }
 0x3f4   : > { %v1209_v45 = vsel %vm1122_vm5, %v2002_v59, %v1206_v5 }
 0x3f5   : > { %1579 = vcosq.f32 %v1209_v45 }
 0x3f6   : > { %1581 = vsinq.f32 %v1209_v45 }
 0x402   : > { %v1580_v9 = vpop.eup %1579 }
 0x403   : > { %v1582_v11 = vpop.eup %1581  ;;  %v1221_v12 = vxor.u32 2147483648, %v1580_v9 }
 0x404   : > { %v1218_v13 = vxor.u32 2147483648, %v1582_v11 }
 0x405   : > { %v1222_v14 = vsel %vm1220_vm6, %v1221_v12, %v1582_v11 }
 0x406   : > { %v1219_v15 = vsel %vm1217_vm7, %v1580_v9, %v1218_v13 }
 0x407   : > { %v1223_v50 = vsel %vm1216_vm8, %v1219_v15, %v1222_v14 }
 0x408   : > { %v1224_v16 = vsel %vm1213_vm9, nan, %v1223_v50 }
 0x409   : > { %1505 = vmatpush3.msra.mxu1 %v1224_v16 }
 0x40a   : > { %1507 = vmatmul.mubr.msk.f32.vlgmr.msra.gmra.mxu1 %vm1236_vm10, %v1225_v43 }
 0x4ca   : > { %v1306_v21 = vpop.f32.mrf.mxu1 }
 0x4cb   : > { %v1307_v10 = vadd.f32 %v1306_v21, %v1235_v2 }
 0x4cc   : > { %v1508_v59 = vpop.f32.mrf.mxu1 }
 0x4cd   : > { %1583 = vtanh.f32 %v1307_v10 }
 0x4da   : > { %v1584_v46 = vpop.eup %1583 }
 0x4db   : > { %v1311_v22 = vmul.f32 250.0, %v1584_v46 }
 0x4dd   : > { %1312 = vst [vmem:[%s378_s14] sm:$0x1] %v1311_v22 }
 0x4de   : > { %1598 = shalt.err (!%p1595_p3)
}
 0x4df   : > { %s1599_s0 = scalar_lea.hbm %s1324_s18, 16  ;;  %s1603_s14 = scalar_lea.hbm %s2082_s11, 32 }
 0x4e0   : > { %p1600_p4 = scmp.ne.s32.totalorder %s1324_s18, %s1599_s0  ;;  %p1604_p9 = scmp.lt.s32.totalorder %s1324_s18, %s2082_s11 }
 0x4e1   : > { %p1605_p10 = scmp.lt.s32.totalorder %s1603_s14, %s1599_s0 }
 0x4e2   : > { %p1601_p7 = pnand %p1600_p4, %p1758_p5 }
 0x4e3   : > { %p1606_p11 = por %p1605_p10, %p1604_p9 }
 0x4e4   : > { %p1602_p8 = pneg %p1601_p7 }
 0x4e6   : > { %p1607_p12 = pnand %p1606_p11, %p1602_p8 }
 0x4e8   : > { %1610 = shalt.err (!%p1607_p12)
}
 0x4e9   : > { %1521 = dma.vmem_to_hbm [thread:$0]  (%p1758_p5), %s1327_s15, 16, %s1324_s18, %s1314_s23  }
 0x4ea PF: > { %p1527_p13 = scmp.ge.s32.totalorder %s1645_s22, 2  ;;  %s1338_s25 = sand.u32 1, %s1633_s19  }
 0x4eb   : > { %s1339_s26 = scalar_lea.sflag [#allocation4], %s1338_s25 }
 0x4ec   : > { %p1524_p0 = pnand %p1527_p13, %p1762_p6 }
 0x4ee   : > { %p1525_p1 = pneg %p1524_p0 }
 0x4f0   : > { %1628 = dma.done.wait (%p1525_p1), %s1339_s26, 16  }
 0x4f1   : > { %1630 = vsyncadd (%p1525_p1), %s1339_s26, 4294967280  ;;  %p23_p2 = scmp.ge.s32.totalorder %s1745_s24, 4   ;;  %s2089_s19 = smov %s1637_s20 }
 0x4f2   : > { %s2090_s20 = smov %s1641_s21  ;;  %s2091_s21 = smov %s1756_s27 }
 0x4f3   : > { %s2092_s22 = smov %s1745_s24  ;;  %25 = sbr.rel (!%p23_p2) target bundleno = 6 (0x6), region = 99 }
 0x4f8   :  { %1343 = vsyncpa [#allocation4], 1 }
 0x4f9   :  { %1345 = vsyncpa [#allocation4 + $0x1], 1 }

</bundles_post_ra>
